<compile_context>
chip_gen: v5e
topology: v5e:2x2
jax: 0.10.0
libtpu: 0.0.40
codegen_flags: <defaults>
</compile_context>

<pallas_src>
import jax
import jax.numpy as jnp
from jax.experimental import pallas as pl
from jax.experimental.pallas import tpu as pltpu

_MIB = 1024 * 1024


def _poly_kernel(poly_size):
    def kernel(wx_ref, x_ref, o_ref):
        x = x_ref[...].astype(jnp.float32)
        if poly_size == 1:
            acc = jnp.full_like(x, wx_ref[0])
        else:
            # Horner: seed with the two highest coefficients (saves one splat).
            acc = x * wx_ref[poly_size - 1] + wx_ref[poly_size - 2]
            for i in range(poly_size - 3, -1, -1):   # static, small unrolled loop (VPU)
                acc = acc * x + wx_ref[i]
        o_ref[...] = acc.astype(o_ref.dtype)
    return kernel


def _sublane_multiple(itemsize):
    # Packed sub-32-bit dtypes need more sublanes per native tile:
    # f32 -> 8, bf16/f16 -> 16, int8/fp8 -> 32.
    return max(8, 32 // int(itemsize))


def _choose_layout(n, sub):
    """(rows, cols, pad) for a lane-dense 2-D view of the flat length-n array.

    Prefers zero padding and wide columns; among zero-pad options prefers one
    with at least `sub` rows (full sublane tiles). Ragged rows are fine: the
    grid uses partial last blocks, so rows need not be a multiple of `sub`.
    """
    candidates = [c for c in (1024, 512, 256, 128) if n % c == 0]
    for c in candidates:
        if n // c >= sub:
            return n // c, c, 0
    if candidates:
        c = candidates[0]
        return n // c, c, 0
    # Ragged fallback (n not a multiple of 128): pad up to a multiple of 512.
    # TODO(synk): this path still pays a host-side pad + slice (~2 extra HBM
    # passes); an in-kernel masked tail store would remove it.
    c = 512
    rows = -(-n // c)
    return rows, c, rows * c - n


def _target_block_bytes():
    """Per-generation VMEM tile budget for the streaming blocks."""
    kind = ""
    try:
        kind = jax.devices()[0].device_kind.lower()
    except Exception:
        pass
    if "v5 lite" in kind or "v5e" in kind or "v5lite" in kind:
        return 2 * _MIB      # v5e: 16 MiB default scoped VMEM, slower HBM
    if "v7" in kind or "tpu7" in kind:
        return 5 * _MIB      # v7x: 3.2 TB/s HBM -> bigger tiles amortize per-step overhead
    return 3 * _MIB          # v6e and unknown


def _choose_block_rows(rows, cols, itemsize, sub, target_bytes):
    """Largest multiple-of-`sub` row count whose tile stays <= target_bytes.

    No exact-divisor requirement: the grid uses pl.cdiv and Pallas handles the
    partial last block (OOB reads are garbage but are never stored back).
    """
    max_rows = max(sub, (target_bytes // (cols * itemsize)) // sub * sub)
    return rows if rows <= max_rows else max_rows


def _poly_jnp(x, wx):
    """Plain-jnp Horner fast path for tiny inputs (XLA fuses it anyway)."""
    p = wx.shape[0]
    out_dtype = jnp.result_type(x.dtype, wx.dtype)
    acc = jnp.full(x.shape, wx[p - 1], dtype=out_dtype)
    for i in range(p - 2, -1, -1):
        acc = acc * x + wx[i]
    return acc


def poly_forward(x, wx, *, force_pallas=False, small_input_bytes=256 * 1024):
    """Elementwise polynomial with coefficients wx, matching Model.forward."""
    poly_size = int(wx.shape[0])
    orig_shape = x.shape
    out_dtype = jnp.result_type(x.dtype, wx.dtype)

    n = int(x.size)
    in_itemsize = jnp.dtype(x.dtype).itemsize
    if not force_pallas and n * in_itemsize <= small_input_bytes:
        # Tiny inputs: pallas_call dispatch + DMA setup dwarfs the useful work.
        return _poly_jnp(x, wx)

    wx32 = wx.astype(jnp.float32)              # SMEM scalar reads want 32-bit
    out_itemsize = jnp.dtype(out_dtype).itemsize
    sub = _sublane_multiple(min(in_itemsize, out_itemsize))

    flat = x.reshape(-1)                       # contiguous reshape: no copy
    rows, cols, pad = _choose_layout(n, sub)
    if pad:
        flat = jnp.pad(flat, (0, pad))
    x2d = flat.reshape(rows, cols)

    target_bytes = _target_block_bytes()
    block_rows = _choose_block_rows(rows, cols, in_itemsize, sub, target_bytes)
    grid = (pl.cdiv(rows, block_rows),)

    # in + out, double-buffered, plus headroom; never below 32 MiB and never
    # above v7x's 64 MiB physical VMEM.
    tile_bytes = block_rows * cols * max(in_itemsize, out_itemsize)
    vmem_limit = int(min(64 * _MIB, max(32 * _MIB, 4 * tile_bytes + 4 * _MIB)))

    out2d = pl.pallas_call(
        _poly_kernel(poly_size),
        out_shape=jax.ShapeDtypeStruct((rows, cols), out_dtype),
        grid_spec=pltpu.PrefetchScalarGridSpec(
            num_scalar_prefetch=0,
            grid=grid,
            in_specs=[
                # Small coefficient vector kept whole in SMEM (scalar reads).
                pl.BlockSpec(memory_space=pltpu.MemorySpace.SMEM),
                # x streamed through VMEM in large lane-dense blocks.
                pl.BlockSpec((block_rows, cols), lambda i: (i, 0)),
            ],
            out_specs=pl.BlockSpec((block_rows, cols), lambda i: (i, 0)),
        ),
        # TODO(synk): on v7x consider pltpu.CORE_PARALLEL and pl.Buffered(3)
        # on the x spec once the grid has >= 2 blocks per core.
        compiler_params=pltpu.CompilerParams(
            dimension_semantics=("parallel",),
            vmem_limit_bytes=vmem_limit),
    )(wx32, x2d)

    if pad:
        return out2d.reshape(-1)[:n].reshape(orig_shape)
    return out2d.reshape(orig_shape)


def poly_reference(x, wx):
    """Power-sum form, matching the PyTorch module exactly."""
    y = jnp.zeros(x.shape, dtype=jnp.result_type(x.dtype, wx.dtype))
    xe = jnp.ones_like(x)
    for i in range(wx.shape[0]):
        y = y + wx[i] * xe
        xe = xe * x
    return y


if __name__ == "__main__":
    key = jax.random.PRNGKey(0)
    k1, k2 = jax.random.split(key)

    poly_size = 4
    # Deterministic "torch.randn(polySize)"-equivalent parameter init.
    wx = jax.random.normal(k1, (poly_size,), dtype=jnp.float32)

    # 1) The module's demo shape, forced through the Pallas kernel.
    x = jax.random.normal(k2, (2, 4, 16, 16), dtype=jnp.float32)
    out = jax.block_until_ready(poly_forward(x, wx, force_pallas=True))
    ref = poly_reference(x, wx)
    assert out.shape == x.shape and out.dtype == ref.dtype
    assert jnp.allclose(out, ref, atol=1e-5, rtol=1e-5)

    k3, k4 = jax.random.split(jax.random.PRNGKey(1))

    # 2) Multi-block grid with a partial last block (no exact-divisor tiling).
    x_big = jax.random.normal(k3, (8, 250, 1024), dtype=jnp.float32)   # 2_048_000 elems
    out_big = jax.block_until_ready(poly_forward(x_big, wx))
    assert jnp.allclose(out_big, poly_reference(x_big, wx), atol=1e-4, rtol=1e-4)

    # 3) Ragged size (not a multiple of 128) exercising the padded fallback.
    x_rag = jax.random.normal(k4, (3, 7, 11, 13), dtype=jnp.float32)   # 3003 elems
    out_rag = jax.block_until_ready(poly_forward(x_rag, wx, force_pallas=True))
    assert jnp.allclose(out_rag, poly_reference(x_rag, wx), atol=1e-4, rtol=1e-4)

    print("KERNEL_OK")
</pallas_src>

<mosaic_0001>
module attributes {stable_mosaic.version = 11 : i64} {
  func.func @kernel(%arg0: i32, %arg1: memref<4xf32, #tpu.memory_space<smem>>, %arg2: memref<8x256xf32, #tpu.memory_space<vmem>>, %arg3: memref<8x256xf32, #tpu.memory_space<vmem>>) attributes {dimension_semantics = [#tpu.dimension_semantics<parallel>], iteration_bounds = array<i64: 1>, scalar_prefetch = 0 : i64, scratch_operands = 0 : i64, tpu.core_type = #tpu.core_type<tc>, window_params = [{transform_indices = @transform_0, window_bounds = array<i64: 4>}, {transform_indices = @transform_1, window_bounds = array<i64: 8, 256>}, {transform_indices = @transform_2, window_bounds = array<i64: 8, 256>}]} {
    %c0 = arith.constant 0 : index
    %c0_0 = arith.constant 0 : index
    %0 = vector.load %arg2[%c0, %c0_0] : memref<8x256xf32, #tpu.memory_space<vmem>>, vector<8x256xf32>
    %c3 = arith.constant 3 : index
    %1 = memref.load %arg1[%c3] : memref<4xf32, #tpu.memory_space<smem>>
    %2 = vector.broadcast %1 : f32 to vector<8x256xf32>
    %3 = arith.mulf %0, %2 : vector<8x256xf32>
    %c2 = arith.constant 2 : index
    %4 = memref.load %arg1[%c2] : memref<4xf32, #tpu.memory_space<smem>>
    %5 = vector.broadcast %4 : f32 to vector<8x256xf32>
    %6 = arith.addf %3, %5 : vector<8x256xf32>
    %7 = arith.mulf %6, %0 : vector<8x256xf32>
    %c1 = arith.constant 1 : index
    %8 = memref.load %arg1[%c1] : memref<4xf32, #tpu.memory_space<smem>>
    %9 = vector.broadcast %8 : f32 to vector<8x256xf32>
    %10 = arith.addf %7, %9 : vector<8x256xf32>
    %11 = arith.mulf %10, %0 : vector<8x256xf32>
    %c0_1 = arith.constant 0 : index
    %12 = memref.load %arg1[%c0_1] : memref<4xf32, #tpu.memory_space<smem>>
    %13 = vector.broadcast %12 : f32 to vector<8x256xf32>
    %14 = arith.addf %11, %13 : vector<8x256xf32>
    %c0_2 = arith.constant 0 : index
    %c0_3 = arith.constant 0 : index
    %15 = vector.load %arg3[%c0_2, %c0_3] : memref<8x256xf32, #tpu.memory_space<vmem>>, vector<8x256xf32>
    tpu.vector_store %arg3[%c0_2, %c0_3], %14 {strides = array<i32>} : memref<8x256xf32, #tpu.memory_space<vmem>>, vector<8x256xf32>,
    return
  }
  func.func @transform_0(%arg0: i32) -> i32 {
    %c0_i32 = arith.constant 0 : i32
    %c0_i32_0 = arith.constant 0 : i32
    return %c0_i32 : i32
  }
  func.func @transform_1(%arg0: i32) -> (i32, i32) {
    %c0_i32 = arith.constant 0 : i32
    %c0_i32_0 = arith.constant 0 : i32
    return %arg0, %c0_i32 : i32, i32
  }
  func.func @transform_2(%arg0: i32) -> (i32, i32) {
    %c0_i32 = arith.constant 0 : i32
    %c0_i32_0 = arith.constant 0 : i32
    return %arg0, %c0_i32 : i32, i32
  }
}

</mosaic_0001>

<bundles_post_ra>
// kernel: tpu_custom_call.1
= control target key start
LH: loop header
LB: loop body
LE: loop exit
PB: predicated region body
PF: predicated region fallthrough
CT: control target
= control target key end

     0   :  { %7 = vsyncpa [#allocation5], 0  ;;  %s180_s0 = inlined_call_operand.hbm [shape: f32[4], index: 0, kind: input, shape index: {}]   ;;  %s181_s1 = inlined_call_operand.hbm [shape: f32[8,256], index: 1, kind: input, shape index: {}]   ;;  %s182_s2 = inlined_call_operand.hbm [shape: f32[8,256], index: 2, kind: output, shape index: {}]  }
   0x1   :  { %8 = vsyncpa [#allocation3], 0 }
   0x2   :  { %9 = vsyncpa [#allocation4], 0  ;;  %s15_s11 = sshll.u32 %s180_s0, 4  ;;  %s24_s14 = sshll.u32 %s181_s1, 4  ;;  %s16_s11 = int_to_ptr.hbm [resolvable:$true] %s15_s11  ;;  %s25_s14 = int_to_ptr.hbm [resolvable:$true] %s24_s14 }
   0x3   :  { %s153_s15 = smov [#allocation2]   ;;  %s154_s16 = smov [#allocation6]  }
   0x4   :  { %18 = dma.hbm_to_smem %s16_s11, 16, %s153_s15, [#allocation5]  }
   0x5   :  { %s26_s17 = sshll.u32 %s154_s16, 4  ;;  %s27_s17 = int_to_ptr.vmem [resolvable:$true] %s26_s17 }
   0x6   :  { %29 = dma.hbm_to_vmem [thread:$0]  %s25_s14, 256, %s27_s17, [#allocation3]  }
   0x7   :  { %147 = dma.done.wait [#allocation5], 16  }
   0x8   :  { %148 = vsyncadd [#allocation5], 4294967280 }
   0x9   :  { %149 = dma.done.wait [#allocation3], 256  }
   0xa   :  { %150 = vsyncadd [#allocation3], 4294967040 }
   0xb   :  { %38 = sfence }
   0xc   :  { %s81_s18 = sld [smem:[#allocation2 + $0x3]]  ;;  %v39_v0 = vld [vmem:[#allocation6] sm:$0xff]  ;;  %v40_v1 = vld [vmem:[#allocation6 + $0x8] sm:$0xff]  ;;  %s155_s1 = smov [#allocation7]  }
   0xd   :  { %s82_s19 = sld [smem:[#allocation2 + $0x2]]  ;;  %s68_s21 = sshll.u32 %s155_s1, 4  ;;  %s69_s21 = int_to_ptr.vmem [resolvable:$true] %s68_s21 }
   0xe   :  { %s83_s0 = sld [smem:[#allocation2 + $0x1]]  ;;  %s70_s24 = sshll.u32 %s182_s2, 4  ;;  %s71_s24 = int_to_ptr.hbm [resolvable:$true] %s70_s24 }
   0xf   :  { %s57_s20 = sld [smem:[#allocation2]] }
  0x12   :  { %v42_v2 = vstv %s81_s18 }
  0x13   :  { %v43_v3 = vmul.f32 %v42_v2, %v39_v0  ;;  %v46_v4 = vstv %s82_s19  ;;  %v44_v5 = vmul.f32 %v42_v2, %v40_v1 }
  0x14   :  { %v52_v8 = vstv %s83_s0 }
  0x15   :  { %v47_v6 = vadd.f32 %v46_v4, %v43_v3  ;;  %v48_v7 = vadd.f32 %v46_v4, %v44_v5  ;;  %v58_v13 = vstv %s57_s20 }
  0x17   :  { %v49_v9 = vmul.f32 %v47_v6, %v39_v0  ;;  %v50_v10 = vmul.f32 %v48_v7, %v40_v1 }
  0x19   :  { %v53_v11 = vadd.f32 %v52_v8, %v49_v9  ;;  %v54_v12 = vadd.f32 %v52_v8, %v50_v10 }
  0x1b   :  { %v55_v14 = vmul.f32 %v53_v11, %v39_v0  ;;  %v56_v15 = vmul.f32 %v54_v12, %v40_v1 }
  0x1d   :  { %v59_v16 = vadd.f32 %v58_v13, %v55_v14  ;;  %v60_v17 = vadd.f32 %v58_v13, %v56_v15 }
  0x1f   :  { %61 = vst [vmem:[#allocation7] sm:$0xff] %v59_v16 }
  0x20   :  { %62 = vst [vmem:[#allocation7 + $0x8] sm:$0xff] %v60_v17 }
  0x21   :  { %73 = dma.vmem_to_hbm [thread:$0]  %s69_s21, 256, %s71_s24, [#allocation4]  }
  0x22   :  { %151 = dma.done.wait [#allocation4], 256  }
  0x23   :  { %152 = vsyncadd [#allocation4], 4294967040 }
  0x24   :  { %78 = vsyncpa [#allocation3], 1 }
  0x25   :  { %79 = vsyncpa [#allocation4], 1 }
  0x26   :  { %80 = vsyncpa [#allocation5], 1 }

</bundles_post_ra>
